<compile_context>
chip_gen: v5e
topology: v5e:2x2
jax: 0.10.0
libtpu: 0.0.40
codegen_flags: <defaults>
</compile_context>

<pallas_src>
import functools

import jax
import jax.numpy as jnp
from jax import lax
from jax.experimental import pallas as pl
from jax.experimental.pallas import tpu as pltpu


# ----------------------------------------------------------------------------
# Pallas kernel: tiled matmul + bias + optional ReLU (the conv hot path).
# ----------------------------------------------------------------------------
def _matmul_bias_kernel(a_ref, b_ref, bias_ref, o_ref, acc_ref, *, apply_relu):
    k = pl.program_id(2)

    @pl.when(k == 0)
    def _():
        acc_ref[...] = jnp.zeros_like(acc_ref)

    # bf16 x bf16 -> f32 accumulation on the MXU.
    acc_ref[...] += jnp.dot(
        a_ref[...], b_ref[...], preferred_element_type=jnp.float32
    )

    @pl.when(k == pl.num_programs(2) - 1)
    def _():
        out = acc_ref[...] + bias_ref[...]  # bias_ref is (1, tn) -> broadcasts
        if apply_relu:
            out = jnp.maximum(out, 0.0)
        o_ref[...] = out.astype(o_ref.dtype)


def _round_up(x, m):
    return ((x + m - 1) // m) * m


def _pad2d(x, m0, m1):
    p0 = (-x.shape[0]) % m0
    p1 = (-x.shape[1]) % m1
    if p0 == 0 and p1 == 0:
        return x
    return jnp.pad(x, ((0, p0), (0, p1)))


def matmul_bias_relu(a, b, bias, apply_relu, *, out_dtype=jnp.float32):
    """a:(M,K) @ b:(K,N) + bias:(N,)  [+ ReLU], via a Pallas tiled matmul.

    Operands are fed to the MXU as bf16; accumulation is f32.
    """
    M, K = a.shape
    K2, N = b.shape
    assert K == K2 and bias.shape == (N,)

    # ---- tile selection (weight-streaming memory-bound regime) ----
    # tm: full padded M when small -> grid_i == 1, each weight byte streams once.
    Mp8 = _round_up(M, 8)
    tm = Mp8 if Mp8 <= 512 else 256
    # tn: lane-contiguous weight tiles; cap at 1024 so N=2048 keeps grid_j=2
    # (two parallel iterations -> both v7x TensorCores busy).
    Np128 = _round_up(N, 128)
    tn = Np128 if Np128 <= 1024 else 1024
    # tk: large reduction tile -> few pipeline steps, >=0.5 MiB B DMAs.
    Kp128 = _round_up(K, 128)
    tk = Kp128 if Kp128 <= 2048 else 2048

    # bf16 operands (native MXU path on v5e/v6e/v7x); bias stays f32.
    a_p = _pad2d(a.astype(jnp.bfloat16), tm, tk)
    b_p = _pad2d(b.astype(jnp.bfloat16), tk, tn)
    bias_p = _pad2d(bias.reshape(1, N).astype(jnp.float32), 1, tn)

    Mp, Kp = a_p.shape
    Np = b_p.shape[1]
    grid = (Mp // tm, Np // tn, Kp // tk)

    out_itemsize = jnp.dtype(out_dtype).itemsize
    cost = pl.CostEstimate(
        flops=2 * Mp * Kp * Np,
        transcendentals=0,
        bytes_accessed=Mp * Kp * 2 + Kp * Np * 2 + Mp * Np * out_itemsize + Np * 4,
    )

    out_p = pl.pallas_call(
        functools.partial(_matmul_bias_kernel, apply_relu=apply_relu),
        out_shape=jax.ShapeDtypeStruct((Mp, Np), out_dtype),
        grid_spec=pltpu.PrefetchScalarGridSpec(
            num_scalar_prefetch=0,
            grid=grid,
            in_specs=[
                pl.BlockSpec((tm, tk), lambda i, j, k: (i, k)),
                pl.BlockSpec((tk, tn), lambda i, j, k: (k, j)),
                pl.BlockSpec((1, tn), lambda i, j, k: (0, j)),
            ],
            out_specs=pl.BlockSpec((tm, tn), lambda i, j, k: (i, j)),
            scratch_shapes=[pltpu.VMEM((tm, tn), jnp.float32)],
        ),
        compiler_params=pltpu.CompilerParams(
            dimension_semantics=("parallel", "parallel", "arbitrary"),
            vmem_limit_bytes=48 * 1024 * 1024,
        ),
        cost_estimate=cost,
    )(a_p, b_p, bias_p)

    return out_p[:M, :N]


# ----------------------------------------------------------------------------
# Conv2d(kernel=2, stride=2, pad=0) on NHWC == space-to-depth(2x2) + matmul.
# Channels stay in the lane dimension; no NCHW round-trips between layers.
# ----------------------------------------------------------------------------
def conv2x2_s2_nhwc(x_nhwc, w_oihw, bias, apply_relu, out_dtype):
    N, H, W, C = x_nhwc.shape
    Co = w_oihw.shape[0]
    Ho, Wo = H // 2, W // 2

    # Patch vector ordered as (kh, kw, ci); channels remain innermost (lanes).
    patches = (
        x_nhwc.reshape(N, Ho, 2, Wo, 2, C)
        .transpose(0, 1, 3, 2, 4, 5)          # (N, Ho, Wo, kh, kw, C)
        .reshape(N * Ho * Wo, 4 * C)
    )
    # Weight rows reordered to match the (kh, kw, ci) patch ordering.
    w_mat = w_oihw.transpose(2, 3, 1, 0).reshape(4 * C, Co)   # (4*C, Co)

    out = matmul_bias_relu(patches, w_mat, bias, apply_relu, out_dtype=out_dtype)
    return out.reshape(N, Ho, Wo, Co)          # stays NHWC


# ----------------------------------------------------------------------------
# BN_Compressor forward (takes / returns NCHW like the PyTorch module).
# ----------------------------------------------------------------------------
def bn_compressor_forward(x_nchw, params):
    x = jnp.transpose(x_nchw, (0, 2, 3, 1))    # NCHW -> NHWC once
    # Layers 1/2 emit bf16 (next layer's A operand is bf16 anyway); final f32.
    x = conv2x2_s2_nhwc(x, params["w1"], params["b1"], True, jnp.bfloat16)
    x = conv2x2_s2_nhwc(x, params["w2"], params["b2"], True, jnp.bfloat16)
    x = conv2x2_s2_nhwc(x, params["w3"], params["b3"], False, jnp.float32)
    return jnp.transpose(x, (0, 3, 1, 2))      # NHWC -> NCHW once


def init_params(key, in_dim):
    c1, c2, c3 = in_dim // 2, in_dim // 4, in_dim // 4  # mirrors 4096->2048->1024->1024
    ks = jax.random.split(key, 6)

    def conv_init(kw, kb, cout, cin):
        fan_in = cin * 2 * 2
        bound = 1.0 / jnp.sqrt(fan_in)
        w = jax.random.uniform(kw, (cout, cin, 2, 2), jnp.float32, -bound, bound)
        b = jax.random.uniform(kb, (cout,), jnp.float32, -bound, bound)
        return w, b

    w1, b1 = conv_init(ks[0], ks[1], c1, in_dim)
    w2, b2 = conv_init(ks[2], ks[3], c2, c1)
    w3, b3 = conv_init(ks[4], ks[5], c3, c2)
    return {"w1": w1, "b1": b1, "w2": w2, "b2": b2, "w3": w3, "b3": b3}


def _reference_forward(x, params, *, low_precision):
    """Pure-JAX reference using lax.conv.

    low_precision=True mirrors the kernel's numerics (bf16 operands, f32
    accumulation, bf16 intermediate activations) for a tight correctness check.
    """
    op_dtype = jnp.bfloat16 if low_precision else jnp.float32

    def conv(x, w, b, relu, out_dtype):
        y = lax.conv_general_dilated(
            x.astype(op_dtype), w.astype(op_dtype),
            window_strides=(2, 2), padding="VALID",
            dimension_numbers=("NCHW", "OIHW", "NCHW"),
            preferred_element_type=jnp.float32,
        ) + b.reshape(1, -1, 1, 1)
        if relu:
            y = jnp.maximum(y, 0.0)
        return y.astype(out_dtype)

    mid_dtype = jnp.bfloat16 if low_precision else jnp.float32
    x = conv(x, params["w1"], params["b1"], True, mid_dtype)
    x = conv(x, params["w2"], params["b2"], True, mid_dtype)
    x = conv(x, params["w3"], params["b3"], False, jnp.float32)
    return x


if __name__ == "__main__":
    key = jax.random.PRNGKey(0)
    k_x, k_p = jax.random.split(key)

    in_dim = 32           # scaled-down stand-in for 4096
    batch, spatial = 2, 16
    x = jax.random.normal(k_x, (batch, in_dim, spatial, spatial), jnp.float32)
    params = init_params(k_p, in_dim)

    fwd = jax.jit(bn_compressor_forward)
    out = jax.block_until_ready(fwd(x, params))

    assert out.shape == (batch, in_dim // 4, spatial // 8, spatial // 8)

    # Tight check vs a numerics-matched (bf16 operand / f32 accum) reference.
    ref_lp = _reference_forward(x, params, low_precision=True)
    assert jnp.allclose(out, ref_lp, atol=2e-3, rtol=2e-3), (
        float(jnp.max(jnp.abs(out - ref_lp))))

    # Loose sanity check vs the full-f32 reference (bf16 quantization error).
    ref_f32 = _reference_forward(x, params, low_precision=False)
    assert jnp.allclose(out, ref_f32, atol=1e-1, rtol=1e-1), (
        float(jnp.max(jnp.abs(out - ref_f32))))

    print("KERNEL_OK")
</pallas_src>

<mosaic_0001>
module attributes {stable_mosaic.version = 11 : i64} {
  func.func @_matmul_bias_kernel(%arg0: i32, %arg1: i32, %arg2: i32, %arg3: memref<128x128xbf16, #tpu.memory_space<vmem>>, %arg4: memref<128x128xbf16, #tpu.memory_space<vmem>>, %arg5: memref<1x128xf32, #tpu.memory_space<vmem>>, %arg6: memref<128x128xbf16, #tpu.memory_space<vmem>>, %arg7: memref<128x128xf32, #tpu.memory_space<vmem>>) attributes {dimension_semantics = [#tpu.dimension_semantics<parallel>, #tpu.dimension_semantics<parallel>, #tpu.dimension_semantics<arbitrary>], iteration_bounds = array<i64: 1, 1, 1>, scalar_prefetch = 0 : i64, scratch_operands = 1 : i64, tpu.core_type = #tpu.core_type<tc>, window_params = [{transform_indices = @transform_0, window_bounds = array<i64: 128, 128>}, {transform_indices = @transform_1, window_bounds = array<i64: 128, 128>}, {transform_indices = @transform_2, window_bounds = array<i64: 1, 128>}, {transform_indices = @transform_3, window_bounds = array<i64: 128, 128>}]} {
    %c0_i32 = arith.constant 0 : i32
    %0 = arith.cmpi eq, %arg2, %c0_i32 : i32
    %1 = arith.extui %0 : i1 to i32
    %c0_i32_0 = arith.constant 0 : i32
    %2 = arith.cmpi ne, %1, %c0_i32_0 : i32
    scf.if %2 {
      %cst_10 = arith.constant 0.000000e+00 : f32
      %12 = vector.broadcast %cst_10 : f32 to vector<128x128xf32>
      %c0_11 = arith.constant 0 : index
      %c0_12 = arith.constant 0 : index
      %13 = vector.load %arg7[%c0_11, %c0_12] : memref<128x128xf32, #tpu.memory_space<vmem>>, vector<128x128xf32>
      tpu.vector_store %arg7[%c0_11, %c0_12], %12 {strides = array<i32>} : memref<128x128xf32, #tpu.memory_space<vmem>>, vector<128x128xf32>,
    } else {
    }
    %c0 = arith.constant 0 : index
    %c0_1 = arith.constant 0 : index
    %3 = vector.load %arg7[%c0, %c0_1] : memref<128x128xf32, #tpu.memory_space<vmem>>, vector<128x128xf32>
    %c0_2 = arith.constant 0 : index
    %c0_3 = arith.constant 0 : index
    %4 = vector.load %arg3[%c0_2, %c0_3] : memref<128x128xbf16, #tpu.memory_space<vmem>>, vector<128x128xbf16>
    %c0_4 = arith.constant 0 : index
    %c0_5 = arith.constant 0 : index
    %5 = vector.load %arg4[%c0_4, %c0_5] : memref<128x128xbf16, #tpu.memory_space<vmem>>, vector<128x128xbf16>
    %cst = arith.constant dense<0.000000e+00> : vector<128x128xf32>
    %6 = tpu.matmul %4, %5, %cst {dimension_numbers = #tpu.dot_dimension_numbers<[1], [0], [0], [1], [0, 0, 1, 1], [], []>} : vector<128x128xbf16>, vector<128x128xbf16>, vector<128x128xf32> -> vector<128x128xf32>
    %7 = arith.addf %3, %6 : vector<128x128xf32>
    %c0_6 = arith.constant 0 : index
    %c0_7 = arith.constant 0 : index
    %8 = vector.load %arg7[%c0_6, %c0_7] : memref<128x128xf32, #tpu.memory_space<vmem>>, vector<128x128xf32>
    tpu.vector_store %arg7[%c0_6, %c0_7], %7 {strides = array<i32>} : memref<128x128xf32, #tpu.memory_space<vmem>>, vector<128x128xf32>,
    %c0_i32_8 = arith.constant 0 : i32
    %9 = arith.cmpi eq, %arg2, %c0_i32_8 : i32
    %10 = arith.extui %9 : i1 to i32
    %c0_i32_9 = arith.constant 0 : i32
    %11 = arith.cmpi ne, %10, %c0_i32_9 : i32
    scf.if %11 {
      %c0_10 = arith.constant 0 : index
      %c0_11 = arith.constant 0 : index
      %12 = vector.load %arg7[%c0_10, %c0_11] : memref<128x128xf32, #tpu.memory_space<vmem>>, vector<128x128xf32>
      %c0_12 = arith.constant 0 : index
      %c0_13 = arith.constant 0 : index
      %13 = vector.load %arg5[%c0_12, %c0_13] : memref<1x128xf32, #tpu.memory_space<vmem>>, vector<1x128xf32>
      %14 = vector.broadcast %13 : vector<1x128xf32> to vector<128x128xf32>
      %15 = arith.addf %12, %14 : vector<128x128xf32>
      %cst_14 = arith.constant 0.000000e+00 : f32
      %16 = vector.broadcast %cst_14 : f32 to vector<128x128xf32>
      %17 = arith.maximumf %15, %16 : vector<128x128xf32>
      %18 = arith.truncf %17 : vector<128x128xf32> to vector<128x128xbf16>
      %c0_15 = arith.constant 0 : index
      %c0_16 = arith.constant 0 : index
      %19 = vector.load %arg6[%c0_15, %c0_16] : memref<128x128xbf16, #tpu.memory_space<vmem>>, vector<128x128xbf16>
      tpu.vector_store %arg6[%c0_15, %c0_16], %18 {strides = array<i32>} : memref<128x128xbf16, #tpu.memory_space<vmem>>, vector<128x128xbf16>,
    } else {
    }
    return
  }
  func.func @transform_0(%arg0: i32, %arg1: i32, %arg2: i32) -> (i32, i32) {
    %c0_i32 = arith.constant 0 : i32
    return %arg0, %arg2 : i32, i32
  }
  func.func @transform_1(%arg0: i32, %arg1: i32, %arg2: i32) -> (i32, i32) {
    %c0_i32 = arith.constant 0 : i32
    return %arg2, %arg1 : i32, i32
  }
  func.func @transform_2(%arg0: i32, %arg1: i32, %arg2: i32) -> (i32, i32) {
    %c0_i32 = arith.constant 0 : i32
    %c0_i32_0 = arith.constant 0 : i32
    return %c0_i32, %arg1 : i32, i32
  }
  func.func @transform_3(%arg0: i32, %arg1: i32, %arg2: i32) -> (i32, i32) {
    %c0_i32 = arith.constant 0 : i32
    return %arg0, %arg1 : i32, i32
  }
}

module attributes {stable_mosaic.version = 11 : i64} {
  func.func @_matmul_bias_kernel(%arg0: i32, %arg1: i32, %arg2: i32, %arg3: memref<32x128xbf16, #tpu.memory_space<vmem>>, %arg4: memref<128x128xbf16, #tpu.memory_space<vmem>>, %arg5: memref<1x128xf32, #tpu.memory_space<vmem>>, %arg6: memref<32x128xbf16, #tpu.memory_space<vmem>>, %arg7: memref<32x128xf32, #tpu.memory_space<vmem>>) attributes {dimension_semantics = [#tpu.dimension_semantics<parallel>, #tpu.dimension_semantics<parallel>, #tpu.dimension_semantics<arbitrary>], iteration_bounds = array<i64: 1, 1, 1>, scalar_prefetch = 0 : i64, scratch_operands = 1 : i64, tpu.core_type = #tpu.core_type<tc>, window_params = [{transform_indices = @transform_0, window_bounds = array<i64: 32, 128>}, {transform_indices = @transform_1, window_bounds = array<i64: 128, 128>}, {transform_indices = @transform_2, window_bounds = array<i64: 1, 128>}, {transform_indices = @transform_3, window_bounds = array<i64: 32, 128>}]} {
    %c0_i32 = arith.constant 0 : i32
    %0 = arith.cmpi eq, %arg2, %c0_i32 : i32
    %1 = arith.extui %0 : i1 to i32
    %c0_i32_0 = arith.constant 0 : i32
    %2 = arith.cmpi ne, %1, %c0_i32_0 : i32
    scf.if %2 {
      %cst_10 = arith.constant 0.000000e+00 : f32
      %12 = vector.broadcast %cst_10 : f32 to vector<32x128xf32>
      %c0_11 = arith.constant 0 : index
      %c0_12 = arith.constant 0 : index
      %13 = vector.load %arg7[%c0_11, %c0_12] : memref<32x128xf32, #tpu.memory_space<vmem>>, vector<32x128xf32>
      tpu.vector_store %arg7[%c0_11, %c0_12], %12 {strides = array<i32>} : memref<32x128xf32, #tpu.memory_space<vmem>>, vector<32x128xf32>,
    } else {
    }
    %c0 = arith.constant 0 : index
    %c0_1 = arith.constant 0 : index
    %3 = vector.load %arg7[%c0, %c0_1] : memref<32x128xf32, #tpu.memory_space<vmem>>, vector<32x128xf32>
    %c0_2 = arith.constant 0 : index
    %c0_3 = arith.constant 0 : index
    %4 = vector.load %arg3[%c0_2, %c0_3] : memref<32x128xbf16, #tpu.memory_space<vmem>>, vector<32x128xbf16>
    %c0_4 = arith.constant 0 : index
    %c0_5 = arith.constant 0 : index
    %5 = vector.load %arg4[%c0_4, %c0_5] : memref<128x128xbf16, #tpu.memory_space<vmem>>, vector<128x128xbf16>
    %cst = arith.constant dense<0.000000e+00> : vector<32x128xf32>
    %6 = tpu.matmul %4, %5, %cst {dimension_numbers = #tpu.dot_dimension_numbers<[1], [0], [0], [1], [0, 0, 1, 1], [], []>} : vector<32x128xbf16>, vector<128x128xbf16>, vector<32x128xf32> -> vector<32x128xf32>
    %7 = arith.addf %3, %6 : vector<32x128xf32>
    %c0_6 = arith.constant 0 : index
    %c0_7 = arith.constant 0 : index
    %8 = vector.load %arg7[%c0_6, %c0_7] : memref<32x128xf32, #tpu.memory_space<vmem>>, vector<32x128xf32>
    tpu.vector_store %arg7[%c0_6, %c0_7], %7 {strides = array<i32>} : memref<32x128xf32, #tpu.memory_space<vmem>>, vector<32x128xf32>,
    %c0_i32_8 = arith.constant 0 : i32
    %9 = arith.cmpi eq, %arg2, %c0_i32_8 : i32
    %10 = arith.extui %9 : i1 to i32
    %c0_i32_9 = arith.constant 0 : i32
    %11 = arith.cmpi ne, %10, %c0_i32_9 : i32
    scf.if %11 {
      %c0_10 = arith.constant 0 : index
      %c0_11 = arith.constant 0 : index
      %12 = vector.load %arg7[%c0_10, %c0_11] : memref<32x128xf32, #tpu.memory_space<vmem>>, vector<32x128xf32>
      %c0_12 = arith.constant 0 : index
      %c0_13 = arith.constant 0 : index
      %13 = vector.load %arg5[%c0_12, %c0_13] : memref<1x128xf32, #tpu.memory_space<vmem>>, vector<1x128xf32>
      %14 = vector.broadcast %13 : vector<1x128xf32> to vector<32x128xf32>
      %15 = arith.addf %12, %14 : vector<32x128xf32>
      %cst_14 = arith.constant 0.000000e+00 : f32
      %16 = vector.broadcast %cst_14 : f32 to vector<32x128xf32>
      %17 = arith.maximumf %15, %16 : vector<32x128xf32>
      %18 = arith.truncf %17 : vector<32x128xf32> to vector<32x128xbf16>
      %c0_15 = arith.constant 0 : index
      %c0_16 = arith.constant 0 : index
      %19 = vector.load %arg6[%c0_15, %c0_16] : memref<32x128xbf16, #tpu.memory_space<vmem>>, vector<32x128xbf16>
      tpu.vector_store %arg6[%c0_15, %c0_16], %18 {strides = array<i32>} : memref<32x128xbf16, #tpu.memory_space<vmem>>, vector<32x128xbf16>,
    } else {
    }
    return
  }
  func.func @transform_0(%arg0: i32, %arg1: i32, %arg2: i32) -> (i32, i32) {
    %c0_i32 = arith.constant 0 : i32
    return %arg0, %arg2 : i32, i32
  }
  func.func @transform_1(%arg0: i32, %arg1: i32, %arg2: i32) -> (i32, i32) {
    %c0_i32 = arith.constant 0 : i32
    return %arg2, %arg1 : i32, i32
  }
  func.func @transform_2(%arg0: i32, %arg1: i32, %arg2: i32) -> (i32, i32) {
    %c0_i32 = arith.constant 0 : i32
    %c0_i32_0 = arith.constant 0 : i32
    return %c0_i32, %arg1 : i32, i32
  }
  func.func @transform_3(%arg0: i32, %arg1: i32, %arg2: i32) -> (i32, i32) {
    %c0_i32 = arith.constant 0 : i32
    return %arg0, %arg1 : i32, i32
  }
}

module attributes {stable_mosaic.version = 11 : i64} {
  func.func @_matmul_bias_kernel(%arg0: i32, %arg1: i32, %arg2: i32, %arg3: memref<8x128xbf16, #tpu.memory_space<vmem>>, %arg4: memref<128x128xbf16, #tpu.memory_space<vmem>>, %arg5: memref<1x128xf32, #tpu.memory_space<vmem>>, %arg6: memref<8x128xf32, #tpu.memory_space<vmem>>, %arg7: memref<8x128xf32, #tpu.memory_space<vmem>>) attributes {dimension_semantics = [#tpu.dimension_semantics<parallel>, #tpu.dimension_semantics<parallel>, #tpu.dimension_semantics<arbitrary>], iteration_bounds = array<i64: 1, 1, 1>, scalar_prefetch = 0 : i64, scratch_operands = 1 : i64, tpu.core_type = #tpu.core_type<tc>, window_params = [{transform_indices = @transform_0, window_bounds = array<i64: 8, 128>}, {transform_indices = @transform_1, window_bounds = array<i64: 128, 128>}, {transform_indices = @transform_2, window_bounds = array<i64: 1, 128>}, {transform_indices = @transform_3, window_bounds = array<i64: 8, 128>}]} {
    %c0_i32 = arith.constant 0 : i32
    %0 = arith.cmpi eq, %arg2, %c0_i32 : i32
    %1 = arith.extui %0 : i1 to i32
    %c0_i32_0 = arith.constant 0 : i32
    %2 = arith.cmpi ne, %1, %c0_i32_0 : i32
    scf.if %2 {
      %cst_10 = arith.constant 0.000000e+00 : f32
      %12 = vector.broadcast %cst_10 : f32 to vector<8x128xf32>
      %c0_11 = arith.constant 0 : index
      %c0_12 = arith.constant 0 : index
      %13 = vector.load %arg7[%c0_11, %c0_12] : memref<8x128xf32, #tpu.memory_space<vmem>>, vector<8x128xf32>
      tpu.vector_store %arg7[%c0_11, %c0_12], %12 {strides = array<i32>} : memref<8x128xf32, #tpu.memory_space<vmem>>, vector<8x128xf32>,
    } else {
    }
    %c0 = arith.constant 0 : index
    %c0_1 = arith.constant 0 : index
    %3 = vector.load %arg7[%c0, %c0_1] : memref<8x128xf32, #tpu.memory_space<vmem>>, vector<8x128xf32>
    %c0_2 = arith.constant 0 : index
    %c0_3 = arith.constant 0 : index
    %4 = vector.load %arg3[%c0_2, %c0_3] : memref<8x128xbf16, #tpu.memory_space<vmem>>, vector<8x128xbf16>
    %c0_4 = arith.constant 0 : index
    %c0_5 = arith.constant 0 : index
    %5 = vector.load %arg4[%c0_4, %c0_5] : memref<128x128xbf16, #tpu.memory_space<vmem>>, vector<128x128xbf16>
    %cst = arith.constant dense<0.000000e+00> : vector<8x128xf32>
    %6 = tpu.matmul %4, %5, %cst {dimension_numbers = #tpu.dot_dimension_numbers<[1], [0], [0], [1], [0, 0, 1, 1], [], []>} : vector<8x128xbf16>, vector<128x128xbf16>, vector<8x128xf32> -> vector<8x128xf32>
    %7 = arith.addf %3, %6 : vector<8x128xf32>
    %c0_6 = arith.constant 0 : index
    %c0_7 = arith.constant 0 : index
    %8 = vector.load %arg7[%c0_6, %c0_7] : memref<8x128xf32, #tpu.memory_space<vmem>>, vector<8x128xf32>
    tpu.vector_store %arg7[%c0_6, %c0_7], %7 {strides = array<i32>} : memref<8x128xf32, #tpu.memory_space<vmem>>, vector<8x128xf32>,
    %c0_i32_8 = arith.constant 0 : i32
    %9 = arith.cmpi eq, %arg2, %c0_i32_8 : i32
    %10 = arith.extui %9 : i1 to i32
    %c0_i32_9 = arith.constant 0 : i32
    %11 = arith.cmpi ne, %10, %c0_i32_9 : i32
    scf.if %11 {
      %c0_10 = arith.constant 0 : index
      %c0_11 = arith.constant 0 : index
      %12 = vector.load %arg7[%c0_10, %c0_11] : memref<8x128xf32, #tpu.memory_space<vmem>>, vector<8x128xf32>
      %c0_12 = arith.constant 0 : index
      %c0_13 = arith.constant 0 : index
      %13 = vector.load %arg5[%c0_12, %c0_13] : memref<1x128xf32, #tpu.memory_space<vmem>>, vector<1x128xf32>
      %14 = vector.broadcast %13 : vector<1x128xf32> to vector<8x128xf32>
      %15 = arith.addf %12, %14 : vector<8x128xf32>
      %c0_14 = arith.constant 0 : index
      %c0_15 = arith.constant 0 : index
      %16 = vector.load %arg6[%c0_14, %c0_15] : memref<8x128xf32, #tpu.memory_space<vmem>>, vector<8x128xf32>
      tpu.vector_store %arg6[%c0_14, %c0_15], %15 {strides = array<i32>} : memref<8x128xf32, #tpu.memory_space<vmem>>, vector<8x128xf32>,
    } else {
    }
    return
  }
  func.func @transform_0(%arg0: i32, %arg1: i32, %arg2: i32) -> (i32, i32) {
    %c0_i32 = arith.constant 0 : i32
    return %arg0, %arg2 : i32, i32
  }
  func.func @transform_1(%arg0: i32, %arg1: i32, %arg2: i32) -> (i32, i32) {
    %c0_i32 = arith.constant 0 : i32
    return %arg2, %arg1 : i32, i32
  }
  func.func @transform_2(%arg0: i32, %arg1: i32, %arg2: i32) -> (i32, i32) {
    %c0_i32 = arith.constant 0 : i32
    %c0_i32_0 = arith.constant 0 : i32
    return %c0_i32, %arg1 : i32, i32
  }
  func.func @transform_3(%arg0: i32, %arg1: i32, %arg2: i32) -> (i32, i32) {
    %c0_i32 = arith.constant 0 : i32
    return %arg0, %arg1 : i32, i32
  }
}

</mosaic_0001>

<bundles_post_ra>
// kernel: bn_compressor_forward.3
= control target key start
LH: loop header
LB: loop body
LE: loop exit
PB: predicated region body
PF: predicated region fallthrough
CT: control target
= control target key end

     0   :  { %s597_s1 = inlined_call_operand.vmem [shape: bf16[128,128], index: 1, kind: input, shape index: {}]   ;;  %s598_s2 = inlined_call_operand.vmem [shape: f32[1,128], index: 2, kind: input, shape index: {}]   ;;  %s599_s0 = inlined_call_operand.vmem [shape: bf16[128,128], index: 0, kind: input, shape index: {}]   ;;  %s600_s3 = inlined_call_operand.vmem [shape: bf16[128,128], index: 3, kind: output, shape index: {}]  }
   0x1   :  { %v429_v0 = vld [vmem:[%s597_s1 + $0x38] sm:$0xff]  ;;  %v428_v1 = vld [vmem:[%s597_s1 + $0x30] sm:$0xff]  ;;  %v427_v2 = vld [vmem:[%s597_s1 + $0x28] sm:$0xff] }
   0x2   :  { %178 = vmatpush.bf16.msra.mxu0 %v429_v0  ;;  %477 = vmatpush.bf16.msra.mxu1 %v429_v0  ;;  %v426_v3 = vld [vmem:[%s597_s1 + $0x20] sm:$0xff]  ;;  %v425_v4 = vld [vmem:[%s597_s1 + $0x18] sm:$0xff]  ;;  %v424_v5 = vld [vmem:[%s597_s1 + $0x10] sm:$0xff] }
   0x3   :  { %478 = vmatpush.bf16.msra.mxu2 %v429_v0  ;;  %479 = vmatpush.bf16.msra.mxu3 %v429_v0  ;;  %v423_v6 = vld [vmem:[%s597_s1 + $0x8] sm:$0xff]  ;;  %v422_v7 = vld [vmem:[%s597_s1] sm:$0xff]  ;;  %v416_v9 = vld [vmem:[%s599_s0 + $0x10] sm:$0xff] }
   0x4   :  { %v414_v8 = vld [vmem:[%s599_s0] sm:$0xff]  ;;  %v420_v11 = vld [vmem:[%s599_s0 + $0x30] sm:$0xff]  ;;  %v415_v12 = vld [vmem:[%s599_s0 + $0x8] sm:$0xff] }
   0x5   :  { %v418_v10 = vld [vmem:[%s599_s0 + $0x20] sm:$0xff]  ;;  %v417_v13 = vld [vmem:[%s599_s0 + $0x18] sm:$0xff]  ;;  %v419_v14 = vld [vmem:[%s599_s0 + $0x28] sm:$0xff] }
   0x6   :  { %179 = vmatpush.bf16.msra.mxu0 %v428_v1  ;;  %480 = vmatpush.bf16.msra.mxu1 %v428_v1  ;;  %v421_v15 = vld [vmem:[%s599_s0 + $0x38] sm:$0xff]  ;;  %v501_v18 = vld [vmem:[%s598_s2] ss:$0 sm:$0xff] }
   0x7   :  { %481 = vmatpush.bf16.msra.mxu2 %v428_v1  ;;  %482 = vmatpush.bf16.msra.mxu3 %v428_v1 }
   0xa   :  { %180 = vmatpush.bf16.msra.mxu0 %v427_v2  ;;  %483 = vmatpush.bf16.msra.mxu1 %v427_v2 }
   0xb   :  { %484 = vmatpush.bf16.msra.mxu2 %v427_v2  ;;  %485 = vmatpush.bf16.msra.mxu3 %v427_v2 }
   0xe   :  { %181 = vmatpush.bf16.msra.mxu0 %v426_v3  ;;  %486 = vmatpush.bf16.msra.mxu1 %v426_v3 }
   0xf   :  { %487 = vmatpush.bf16.msra.mxu2 %v426_v3  ;;  %488 = vmatpush.bf16.msra.mxu3 %v426_v3 }
  0x12   :  { %182 = vmatpush.bf16.msra.mxu0 %v425_v4  ;;  %489 = vmatpush.bf16.msra.mxu1 %v425_v4 }
  0x13   :  { %490 = vmatpush.bf16.msra.mxu2 %v425_v4  ;;  %491 = vmatpush.bf16.msra.mxu3 %v425_v4 }
  0x16   :  { %183 = vmatpush.bf16.msra.mxu0 %v424_v5  ;;  %492 = vmatpush.bf16.msra.mxu1 %v424_v5 }
  0x17   :  { %493 = vmatpush.bf16.msra.mxu2 %v424_v5  ;;  %494 = vmatpush.bf16.msra.mxu3 %v424_v5 }
  0x1a   :  { %184 = vmatpush.bf16.msra.mxu0 %v423_v6  ;;  %495 = vmatpush.bf16.msra.mxu1 %v423_v6 }
  0x1b   :  { %496 = vmatpush.bf16.msra.mxu2 %v423_v6  ;;  %497 = vmatpush.bf16.msra.mxu3 %v423_v6 }
  0x1e   :  { %185 = vmatpush.bf16.msra.mxu0 %v422_v7  ;;  %498 = vmatpush.bf16.msra.mxu1 %v422_v7 }
  0x1f   :  { %499 = vmatpush.bf16.msra.mxu2 %v422_v7  ;;  %500 = vmatpush.bf16.msra.mxu3 %v422_v7 }
  0x21   :  { %186 = vmatmul.bf16.vlgmr.msra.gmra.mxu0 %v414_v8  ;;  %196 = vmatmul.bf16.vlgmr.msra.gmra.mxu1 %v416_v9 }
  0x22   :  { %206 = vmatmul.bf16.vlgmr.msra.gmra.mxu2 %v418_v10  ;;  %216 = vmatmul.bf16.vlgmr.msra.gmra.mxu3 %v420_v11 }
  0x31   :  { %191 = vmatmul.bf16.gmra.mxu0 %v415_v12  ;;  %201 = vmatmul.bf16.gmra.mxu1 %v417_v13 }
  0x32   :  { %211 = vmatmul.bf16.gmra.mxu2 %v419_v14  ;;  %221 = vmatmul.bf16.gmra.mxu3 %v421_v15 }
  0x9e   :  { %v187_v16 = vpop.f32.mrf.mxu0  ;;  %v197_v17 = vpop.f32.mrf.mxu1 }
  0x9f   :  { %v282_v19 = vadd.f32 %v501_v18, %v187_v16  ;;  %v286_v20 = vadd.f32 %v501_v18, %v197_v17 }
  0xa1   :  { %v298_v27 = vmax.f32 %v282_v19, 0.0  ;;  %v302_v28 = vmax.f32 %v286_v20, 0.0 }
  0xa5   :  { %v207_v21 = vpop.f32.mrf.mxu2  ;;  %v217_v22 = vpop.f32.mrf.mxu3 }
  0xa6   :  { %v189_v23 = vpop.f32.mrf.mxu0  ;;  %v199_v24 = vpop.f32.mrf.mxu1  ;;  %v290_v33 = vadd.f32 %v501_v18, %v207_v21  ;;  %v294_v34 = vadd.f32 %v501_v18, %v217_v22 }
  0xa7   :  { %v283_v25 = vadd.f32 %v501_v18, %v189_v23  ;;  %v287_v26 = vadd.f32 %v501_v18, %v199_v24 }
  0xa8   :  { %v306_v41 = vmax.f32 %v290_v33, 0.0  ;;  %v310_v42 = vmax.f32 %v294_v34, 0.0 }
  0xa9   :  { %v299_v29 = vmax.f32 %v283_v25, 0.0  ;;  %v303_v30 = vmax.f32 %v287_v26, 0.0 }
  0xab   :  { %v433_v31 = vpack.c.bf16 %v299_v29, %v298_v27  ;;  %v443_v32 = vpack.c.bf16 %v303_v30, %v302_v28 }
  0xad   :  { %434 = vst [vmem:[%s600_s3] sm:$0xff] %v433_v31   ;;  %v209_v35 = vpop.f32.mrf.mxu2  ;;  %v219_v36 = vpop.f32.mrf.mxu3 }
  0xae   :  { %471 = vst [vmem:[%s600_s3 + $0x10] sm:$0xff] %v443_v32   ;;  %v291_v37 = vadd.f32 %v501_v18, %v209_v35  ;;  %v295_v38 = vadd.f32 %v501_v18, %v219_v36  ;;  %v192_v39 = vpop.f32.mrf.mxu0  ;;  %v202_v40 = vpop.f32.mrf.mxu1 }
  0xaf   :  { %v284_v47 = vadd.f32 %v501_v18, %v192_v39  ;;  %v288_v48 = vadd.f32 %v501_v18, %v202_v40 }
  0xb0   :  { %v307_v43 = vmax.f32 %v291_v37, 0.0  ;;  %v311_v44 = vmax.f32 %v295_v38, 0.0 }
  0xb1   :  { %v300_v55 = vmax.f32 %v284_v47, 0.0  ;;  %v304_v56 = vmax.f32 %v288_v48, 0.0 }
  0xb2   :  { %v453_v45 = vpack.c.bf16 %v307_v43, %v306_v41  ;;  %v463_v46 = vpack.c.bf16 %v311_v44, %v310_v42 }
  0xb4   :  { %473 = vst [vmem:[%s600_s3 + $0x20] sm:$0xff] %v453_v45  }
  0xb5   :  { %475 = vst [vmem:[%s600_s3 + $0x30] sm:$0xff] %v463_v46   ;;  %v212_v49 = vpop.f32.mrf.mxu2  ;;  %v222_v50 = vpop.f32.mrf.mxu3 }
  0xb6   :  { %v194_v51 = vpop.f32.mrf.mxu0  ;;  %v204_v52 = vpop.f32.mrf.mxu1  ;;  %v292_v61 = vadd.f32 %v501_v18, %v212_v49  ;;  %v296_v62 = vadd.f32 %v501_v18, %v222_v50 }
  0xb7   :  { %v285_v53 = vadd.f32 %v501_v18, %v194_v51  ;;  %v289_v54 = vadd.f32 %v501_v18, %v204_v52 }
  0xb8   :  { %v308_v3 = vmax.f32 %v292_v61, 0.0  ;;  %v312_v4 = vmax.f32 %v296_v62, 0.0 }
  0xb9   :  { %v301_v57 = vmax.f32 %v285_v53, 0.0  ;;  %v305_v58 = vmax.f32 %v289_v54, 0.0 }
  0xbb   :  { %v438_v59 = vpack.c.bf16 %v301_v57, %v300_v55  ;;  %v448_v60 = vpack.c.bf16 %v305_v58, %v304_v56 }
  0xbd   :  { %470 = vst [vmem:[%s600_s3 + $0x8] sm:$0xff] %v438_v59   ;;  %v214_v63 = vpop.f32.mrf.mxu2  ;;  %v224_v0 = vpop.f32.mrf.mxu3 }
  0xbe   :  { %472 = vst [vmem:[%s600_s3 + $0x18] sm:$0xff] %v448_v60   ;;  %v293_v1 = vadd.f32 %v501_v18, %v214_v63  ;;  %v297_v2 = vadd.f32 %v501_v18, %v224_v0 }
  0xc0   :  { %v309_v5 = vmax.f32 %v293_v1, 0.0  ;;  %v313_v6 = vmax.f32 %v297_v2, 0.0 }
  0xc2   :  { %v458_v7 = vpack.c.bf16 %v309_v5, %v308_v3  ;;  %v468_v8 = vpack.c.bf16 %v313_v6, %v312_v4 }
  0xc4   :  { %474 = vst [vmem:[%s600_s3 + $0x28] sm:$0xff] %v458_v7  }
  0xc5   :  { %476 = vst [vmem:[%s600_s3 + $0x38] sm:$0xff] %v468_v8  }

// kernel: bn_compressor_forward.4
= control target key start
LH: loop header
LB: loop body
LE: loop exit
PB: predicated region body
PF: predicated region fallthrough
CT: control target
= control target key end

     0   :  { %s293_s1 = inlined_call_operand.vmem [shape: bf16[128,128], index: 1, kind: input, shape index: {}]   ;;  %s294_s2 = inlined_call_operand.vmem [shape: f32[1,128], index: 2, kind: input, shape index: {}]   ;;  %s295_s0 = inlined_call_operand.vmem [shape: bf16[32,128], index: 0, kind: input, shape index: {}]   ;;  %s296_s3 = inlined_call_operand.vmem [shape: bf16[32,128], index: 3, kind: output, shape index: {}]  }
   0x1   :  { %v213_v0 = vld [vmem:[%s293_s1 + $0x38] sm:$0xff]  ;;  %v212_v1 = vld [vmem:[%s293_s1 + $0x30] sm:$0xff]  ;;  %v211_v2 = vld [vmem:[%s293_s1 + $0x28] sm:$0xff] }
   0x2   :  { %106 = vmatpush.bf16.msra.mxu0 %v213_v0  ;;  %225 = vmatpush.bf16.msra.mxu1 %v213_v0  ;;  %v210_v3 = vld [vmem:[%s293_s1 + $0x20] sm:$0xff]  ;;  %v209_v4 = vld [vmem:[%s293_s1 + $0x18] sm:$0xff]  ;;  %v208_v5 = vld [vmem:[%s293_s1 + $0x10] sm:$0xff] }
   0x3   :  { %v207_v6 = vld [vmem:[%s293_s1 + $0x8] sm:$0xff]  ;;  %v206_v7 = vld [vmem:[%s293_s1] sm:$0xff] }
   0x4   :  { %v204_v8 = vld [vmem:[%s295_s0] sm:$0xff]  ;;  %v205_v9 = vld [vmem:[%s295_s0 + $0x8] sm:$0xff] }
   0x5   :  { %v233_v12 = vld [vmem:[%s294_s2] ss:$0 sm:$0xff] }
   0x6   :  { %107 = vmatpush.bf16.msra.mxu0 %v212_v1  ;;  %226 = vmatpush.bf16.msra.mxu1 %v212_v1 }
   0xa   :  { %108 = vmatpush.bf16.msra.mxu0 %v211_v2  ;;  %227 = vmatpush.bf16.msra.mxu1 %v211_v2 }
   0xe   :  { %109 = vmatpush.bf16.msra.mxu0 %v210_v3  ;;  %228 = vmatpush.bf16.msra.mxu1 %v210_v3 }
  0x12   :  { %110 = vmatpush.bf16.msra.mxu0 %v209_v4  ;;  %229 = vmatpush.bf16.msra.mxu1 %v209_v4 }
  0x16   :  { %111 = vmatpush.bf16.msra.mxu0 %v208_v5  ;;  %230 = vmatpush.bf16.msra.mxu1 %v208_v5 }
  0x1a   :  { %112 = vmatpush.bf16.msra.mxu0 %v207_v6  ;;  %231 = vmatpush.bf16.msra.mxu1 %v207_v6 }
  0x1e   :  { %113 = vmatpush.bf16.msra.mxu0 %v206_v7  ;;  %232 = vmatpush.bf16.msra.mxu1 %v206_v7 }
  0x21   :  { %114 = vmatmul.bf16.vlgmr.msra.gmra.mxu0 %v204_v8  ;;  %119 = vmatmul.bf16.vlgmr.msra.gmra.mxu1 %v205_v9 }
  0x9e   :  { %v115_v10 = vpop.f32.mrf.mxu0  ;;  %v120_v11 = vpop.f32.mrf.mxu1 }
  0x9f   :  { %v144_v13 = vadd.f32 %v233_v12, %v115_v10  ;;  %v146_v14 = vadd.f32 %v233_v12, %v120_v11 }
  0xa1   :  { %v148_v19 = vmax.f32 %v144_v13, 0.0  ;;  %v150_v20 = vmax.f32 %v146_v14, 0.0 }
  0xa6   :  { %v117_v15 = vpop.f32.mrf.mxu0  ;;  %v122_v16 = vpop.f32.mrf.mxu1 }
  0xa7   :  { %v145_v17 = vadd.f32 %v233_v12, %v117_v15  ;;  %v147_v18 = vadd.f32 %v233_v12, %v122_v16 }
  0xa9   :  { %v149_v21 = vmax.f32 %v145_v17, 0.0  ;;  %v151_v22 = vmax.f32 %v147_v18, 0.0 }
  0xab   :  { %v217_v23 = vpack.c.bf16 %v149_v21, %v148_v19  ;;  %v222_v24 = vpack.c.bf16 %v151_v22, %v150_v20 }
  0xad   :  { %218 = vst [vmem:[%s296_s3] sm:$0xff] %v217_v23  }
  0xae   :  { %224 = vst [vmem:[%s296_s3 + $0x8] sm:$0xff] %v222_v24  }

// kernel: bn_compressor_forward.5
= control target key start
LH: loop header
LB: loop body
LE: loop exit
PB: predicated region body
PF: predicated region fallthrough
CT: control target
= control target key end

     0   :  { %s249_s0 = inlined_call_operand.vmem [shape: bf16[8,128], index: 0, kind: input, shape index: {}]   ;;  %s250_s1 = inlined_call_operand.vmem [shape: bf16[128,128], index: 1, kind: input, shape index: {}]   ;;  %s251_s2 = inlined_call_operand.vmem [shape: f32[1,128], index: 2, kind: input, shape index: {}]   ;;  %s252_s3 = inlined_call_operand.hbm [shape: f32[8,128], index: 3, kind: output, shape index: {}]  }
   0x1   :  { %v166_v0 = vld [vmem:[%s250_s1 + $0x38] sm:$0xff]  ;;  %v165_v1 = vld [vmem:[%s250_s1 + $0x30] sm:$0xff] }
   0x2   :  { %86 = vmatpush.bf16.msra.mxu0 %v166_v0 }
   0x3   :  { %8 = vsyncpa [#allocation4], 0  ;;  %v164_v2 = vld [vmem:[%s250_s1 + $0x28] sm:$0xff]  ;;  %v163_v3 = vld [vmem:[%s250_s1 + $0x20] sm:$0xff]  ;;  %s195_s5 = smov [#allocation3]   ;;  %s118_s9 = sshll.u32 %s252_s3, 4  ;;  %s119_s9 = int_to_ptr.hbm [resolvable:$true] %s118_s9 }
   0x4   :  { %v162_v4 = vld [vmem:[%s250_s1 + $0x18] sm:$0xff]  ;;  %v161_v5 = vld [vmem:[%s250_s1 + $0x10] sm:$0xff]  ;;  %v160_v6 = vld [vmem:[%s250_s1 + $0x8] sm:$0xff]  ;;  %s116_s6 = sshll.u32 %s195_s5, 4  ;;  %s117_s6 = int_to_ptr.vmem [resolvable:$true] %s116_s6 }
   0x5   :  { %v159_v7 = vld [vmem:[%s250_s1] sm:$0xff] }
   0x6   :  { %87 = vmatpush.bf16.msra.mxu0 %v165_v1  ;;  %v21_v8 = vld [vmem:[%s249_s0] sm:$0xf] }
   0x7   :  { %v168_v9 = vld [vmem:[%s251_s2] ss:$0 sm:$0xff] }
   0xa   :  { %88 = vmatpush.bf16.msra.mxu0 %v164_v2 }
   0xe   :  { %89 = vmatpush.bf16.msra.mxu0 %v163_v3 }
  0x12   :  { %90 = vmatpush.bf16.msra.mxu0 %v162_v4 }
  0x16   :  { %91 = vmatpush.bf16.msra.mxu0 %v161_v5 }
  0x1a   :  { %92 = vmatpush.bf16.msra.mxu0 %v160_v6 }
  0x1e   :  { %93 = vmatpush.bf16.msra.mxu0 %v159_v7 }
  0x21   :  { %94 = vmatmul.bf16.vlgmr.msra.gmra.mxu0 %v21_v8 }
  0x9e   :  { %v95_v10 = vpop.f32.mrf.mxu0 }
  0x9f   :  { %v109_v11 = vadd.f32 %v168_v9, %v95_v10 }
  0xa1   :  { %110 = vst [vmem:[#allocation3] sm:$0xff] %v109_v11 }
  0xa2   :  { %121 = dma.vmem_to_hbm [thread:$0]  %s117_s6, 128, %s119_s9, [#allocation4]  }
  0xa6   :  { %v97_v12 = vpop.f32.mrf.mxu0 }
  0xa7   :  { %193 = dma.done.wait [#allocation4], 128  }
  0xa8   :  { %194 = vsyncadd [#allocation4], 4294967168 }
  0xa9   :  { %126 = vsyncpa [#allocation4], 1 }

</bundles_post_ra>
